<compile_context>
chip_gen: v5e
topology: v5e:2x2
jax: 0.10.0
libtpu: 0.0.40
codegen_flags: <defaults>
</compile_context>

<pallas_src>
import functools

import numpy as np
import jax
import jax.numpy as jnp
from jax import lax
from jax.experimental import pallas as pl
from jax.experimental.pallas import tpu as pltpu

M_PLUS = 0.9
M_MINUS = 0.1
LOSS_LAMBDA = 0.5          # MarginLoss loss_lambda
RECON_LOSS_SCALE = 1e-6

# Stats packing (rows of the (10, 128) per-lane-partial output of the row-loss kernel):
#   0: pos count           1: neg count
#   2: sum pos margin      3: sum neg margin
#   4-7: smooth-L1 sums (z, h, w, d)
#   8: pos correct         9: neg correct
_N_STATS = 10
_ROW_BLOCK_ROWS = 512      # sublane rows (128 anchors each) per row-loss step -> 65536 anchors
_SSE_BLOCK_ROWS = 4096     # sublane rows per SSE grid step (2 MiB f32 per input block)
_SSE_CORES = 2             # leading "parallel" grid axis -> 2-way TensorCore split on v7x


# ---------------------------------------------------------------------------
# Kernel 1: margin / smooth-L1 / correctness statistics.
#   Inputs are channel-major (5, rows128, 128); each channel is a full (R, 128)
#   slab -> full sublane utilization. Per-lane partials accumulate into a
#   resident (10, 128) block; the wrapper does the final 128-lane reduction.
# ---------------------------------------------------------------------------
def _row_loss_kernel(n_rows, block_rows, out_ref, lab_ref, stats_ref):
    i = pl.program_id(0)

    @pl.when(i == 0)
    def _():
        stats_ref[...] = jnp.zeros_like(stats_ref)

    p = out_ref[0, :, :].astype(jnp.float32)       # (R, 128) predicted probability
    t0 = lab_ref[0, :, :].astype(jnp.float32)      # (R, 128) label score channel

    pos_b = t0 > 0.5
    neg_b = t0 < -0.5
    if n_rows % block_rows != 0:
        # Only the last grid step hangs over the array edge; mask its garbage rows.
        row = lax.broadcasted_iota(jnp.int32, p.shape, 0) + i * block_rows
        valid = row < n_rows
        pos_b = pos_b & valid
        neg_b = neg_b & valid

    # MarginLoss per-anchor term: T*relu(m+ - p)^2 + lambda*(1-T)*relu(p - m-)^2
    def margin(prob, lab_val):
        t = (lab_val.astype(jnp.int32) == 1).astype(jnp.float32)   # one_hot[..., 1:] after long cast
        left = t * jnp.maximum(M_PLUS - prob, 0.0) ** 2
        right = LOSS_LAMBDA * (1.0 - t) * jnp.maximum(prob - M_MINUS, 0.0) ** 2
        return left + right

    pos = pos_b.astype(jnp.float32)
    neg = neg_b.astype(jnp.float32)
    margin_pos = jnp.where(pos_b, margin(p, t0), 0.0)          # classify_loss(pos_prob, pos_labels[:,0])
    margin_neg = jnp.where(neg_b, margin(p, t0 + 1.0), 0.0)    # classify_loss(neg_prob, neg_labels + 1)
    pos_ok = jnp.where(pos_b & (p >= 0.5), 1.0, 0.0)
    neg_ok = jnp.where(neg_b & (p < 0.5), 1.0, 0.0)

    # Per-lane partial accumulation: one cross-sublane sum per statistic, no
    # cross-lane (XLU) reduction, no (10, T) concatenate, no sub-128-lane store.
    stats_ref[0:1, :] += jnp.sum(pos, axis=0, keepdims=True)
    stats_ref[1:2, :] += jnp.sum(neg, axis=0, keepdims=True)
    stats_ref[2:3, :] += jnp.sum(margin_pos, axis=0, keepdims=True)
    stats_ref[3:4, :] += jnp.sum(margin_neg, axis=0, keepdims=True)
    stats_ref[8:9, :] += jnp.sum(pos_ok, axis=0, keepdims=True)
    stats_ref[9:10, :] += jnp.sum(neg_ok, axis=0, keepdims=True)

    # SmoothL1 (beta=1) on the 4 regression channels, positive anchors only.
    d = out_ref[1:5, :, :].astype(jnp.float32) - lab_ref[1:5, :, :].astype(jnp.float32)
    ad = jnp.abs(d)
    sl1 = jnp.where(ad < 1.0, 0.5 * d * d, ad - 0.5)
    sl1 = jnp.where(pos_b[None, :, :], sl1, 0.0)               # (4, R, 128)
    stats_ref[4:8, :] += jnp.sum(sl1, axis=1)                  # (4, 128)


def _row_loss_stats(out3, lab3):
    rows128 = out3.shape[1]
    block_rows = rows128 if rows128 <= _ROW_BLOCK_ROWS else _ROW_BLOCK_ROWS
    grid = (pl.cdiv(rows128, block_rows),)
    return pl.pallas_call(
        functools.partial(_row_loss_kernel, rows128, block_rows),
        out_shape=jax.ShapeDtypeStruct((_N_STATS, 128), jnp.float32),
        grid=grid,
        in_specs=[pl.BlockSpec((5, block_rows, 128), lambda i: (0, i, 0)),
                  pl.BlockSpec((5, block_rows, 128), lambda i: (0, i, 0))],
        out_specs=pl.BlockSpec((_N_STATS, 128), lambda i: (0, 0)),
        compiler_params=pltpu.CompilerParams(dimension_semantics=("arbitrary",)),
    )(out3, lab3)


# ---------------------------------------------------------------------------
# Kernel 2: tiled sum-of-squared-errors (MSE numerator).
#   Native-dtype inputs, in-kernel cast + ragged-tail masking, per-lane (1, 128)
#   partials per core; leading size-2 "parallel" grid axis splits the reduction
#   across the two TensorCores on v7x (sequential and harmless on v5e/v6e).
# ---------------------------------------------------------------------------
def _sse_kernel(m_rows, block_rows, blocks_per_core, need_mask, x_ref, y_ref, o_ref):
    c = pl.program_id(0)
    i = pl.program_id(1)

    @pl.when(i == 0)
    def _():
        o_ref[...] = jnp.zeros_like(o_ref)

    d = x_ref[...].astype(jnp.float32) - y_ref[...].astype(jnp.float32)
    sq = d * d
    if need_mask:
        # Ragged last block and/or the duplicated (clamped) block on the second core.
        row = (lax.broadcasted_iota(jnp.int32, sq.shape, 0)
               + (c * blocks_per_core + i) * block_rows)
        sq = jnp.where(row < m_rows, sq, 0.0)
    o_ref[...] += jnp.sum(sq, axis=0, keepdims=True)           # (1, 128) per-lane partials


def _sum_squared_error(x2d, y2d):
    m, lanes = x2d.shape
    block_rows = m if m <= _SSE_BLOCK_ROWS else _SSE_BLOCK_ROWS
    n_blocks = pl.cdiv(m, block_rows)
    blocks_per_core = pl.cdiv(n_blocks, _SSE_CORES)
    need_mask = (m % block_rows != 0) or (blocks_per_core * _SSE_CORES != n_blocks)

    if blocks_per_core * _SSE_CORES == n_blocks:
        def in_map(c, i):
            return (c * blocks_per_core + i, 0)
    else:
        def in_map(c, i):
            # Clamp so the trailing core never issues an out-of-bounds DMA; its
            # duplicate block contributes zero via the in-kernel row mask.
            return (jnp.minimum(c * blocks_per_core + i, n_blocks - 1), 0)

    lane_sums = pl.pallas_call(
        functools.partial(_sse_kernel, m, block_rows, blocks_per_core, need_mask),
        out_shape=jax.ShapeDtypeStruct((1, _SSE_CORES * lanes), jnp.float32),
        grid=(_SSE_CORES, blocks_per_core),
        in_specs=[pl.BlockSpec((block_rows, lanes), in_map),
                  pl.BlockSpec((block_rows, lanes), in_map)],
        out_specs=pl.BlockSpec((1, lanes), lambda c, i: (0, c)),
        compiler_params=pltpu.CompilerParams(
            dimension_semantics=("parallel", "arbitrary")),
    )(x2d, y2d)
    return jnp.sum(lane_sums)


# ---------------------------------------------------------------------------
# Loss_recon.forward equivalent (num_hard=0, class_loss='MarginLoss', average=True)
# ---------------------------------------------------------------------------
def loss_recon_forward(output, labels, images, reconstructions,
                       recon_loss_scale=RECON_LOSS_SCALE):
    # ----- detector head: (..., 5) rows -> channel-major (5, rows128, 128) layout -----
    out2d = output.reshape(-1, 5)
    lab2d = labels.reshape(-1, 5)
    n_anchor = out2d.shape[0]
    pad = (-n_anchor) % 128
    if pad:
        # Zero-padded label rows have score 0 -> neither positive nor negative, so
        # they drop out of every statistic. Only taken when n_anchor is not 128-aligned.
        out2d = jnp.pad(out2d, ((0, pad), (0, 0)))
        lab2d = jnp.pad(lab2d, ((0, pad), (0, 0)))
    rows128 = (n_anchor + pad) // 128
    out3 = out2d.T.reshape(5, rows128, 128)     # transpose copy; reshape is free
    lab3 = lab2d.T.reshape(5, rows128, 128)

    stats = jnp.sum(_row_loss_stats(out3, lab3), axis=1)       # (10,)
    pos_cnt, neg_cnt = stats[0], stats[1]
    pos_margin_sum, neg_margin_sum = stats[2], stats[3]
    sl1_sums = stats[4:8]
    pos_cor, neg_cor = stats[8], stats[9]

    has_pos = pos_cnt > 0
    safe_pos = jnp.maximum(pos_cnt, 1.0)

    # NOTE: neg_cnt == 0 yields NaN, matching torch .mean() over an empty tensor.
    neg_margin_mean = neg_margin_sum / neg_cnt
    pos_margin_mean = pos_margin_sum / safe_pos
    regress = jnp.where(has_pos, sl1_sums / safe_pos, jnp.zeros(4, jnp.float32))
    classify_loss = jnp.where(has_pos,
                              0.5 * pos_margin_mean + 0.5 * neg_margin_mean,
                              0.5 * neg_margin_mean)

    # ----- reconstruction MSE (mean over all elements), native dtype -----
    n_el = images.size
    x = reconstructions.reshape(-1)
    y = images.reshape(-1)
    pad_el = (-n_el) % 128
    if pad_el:                                  # <=127 zeros, only if not 128-aligned
        x = jnp.pad(x, (0, pad_el))
        y = jnp.pad(y, (0, pad_el))
    sse = _sum_squared_error(x.reshape(-1, 128), y.reshape(-1, 128))
    reconstruction_loss = recon_loss_scale * sse / n_el

    loss = classify_loss + jnp.sum(regress) + reconstruction_loss

    pos_correct = jnp.where(has_pos, pos_cor, 0.0).astype(jnp.int32)
    pos_total = jnp.where(has_pos, pos_cnt, 0.0).astype(jnp.int32)
    neg_correct = neg_cor.astype(jnp.int32)
    neg_total = neg_cnt.astype(jnp.int32)

    return ([loss, classify_loss]
            + [regress[i] for i in range(4)]
            + [pos_correct, pos_total, neg_correct, neg_total]
            + [reconstruction_loss])


# ---------------------------------------------------------------------------
# Pure-numpy reference of the PyTorch forward (for sanity checking).
# ---------------------------------------------------------------------------
def _reference_loss(output, labels, images, recons):
    o = np.asarray(output, np.float32).reshape(-1, 5)
    l = np.asarray(labels, np.float32).reshape(-1, 5)
    pos = l[:, 0] > 0.5
    neg = l[:, 0] < -0.5
    po, plab = o[pos], l[pos]
    nprob, nlab = o[neg, 0], l[neg, 0]

    def margin(p, lab):
        t = (lab.astype(np.int64) == 1).astype(np.float32)
        lk = t * np.maximum(M_PLUS - p, 0.0) ** 2 \
            + LOSS_LAMBDA * (1.0 - t) * np.maximum(p - M_MINUS, 0.0) ** 2
        return lk.mean()

    def smooth_l1(a, b):
        d = a - b
        ad = np.abs(d)
        return np.where(ad < 1.0, 0.5 * d * d, ad - 0.5).mean()

    if len(po) > 0:
        regress = [smooth_l1(po[:, i], plab[:, i]) for i in range(1, 5)]
        classify = 0.5 * margin(po[:, 0], plab[:, 0]) + 0.5 * margin(nprob, nlab + 1.0)
    else:
        regress = [0.0, 0.0, 0.0, 0.0]
        classify = 0.5 * margin(nprob, nlab + 1.0)
    recon = RECON_LOSS_SCALE * np.mean(
        (np.asarray(recons, np.float32) - np.asarray(images, np.float32)) ** 2)
    return classify + sum(regress) + recon


if __name__ == "__main__":
    key = jax.random.PRNGKey(0)
    k1, k2, k3, k4, k5, k6 = jax.random.split(key, 6)

    # Detector head: (batch, D, H, W, anchors, 5) -> N = 2*4*4*4*3 = 384 rows.
    B, D, H, W, A = 2, 4, 4, 4, 3
    output = jnp.concatenate(
        [jax.random.uniform(k1, (B, D, H, W, A, 1)),                 # probability channel
         0.5 * jax.random.normal(k2, (B, D, H, W, A, 4))], axis=-1)  # regression channels
    u = jax.random.uniform(k3, (B, D, H, W, A, 1))
    lab_score = jnp.where(u < 0.15, 1.0, jnp.where(u < 0.7, -1.0, 0.0))  # {pos, neg, ignore}
    labels = jnp.concatenate(
        [lab_score, 0.5 * jax.random.normal(k4, (B, D, H, W, A, 4))], axis=-1)

    # Reconstruction pair (NCDHW-style volume).
    images = jax.random.normal(k5, (2, 1, 8, 16, 16))
    reconstructions = images + 0.1 * jax.random.normal(k6, images.shape)

    results = jax.jit(loss_recon_forward)(output, labels, images, reconstructions)
    results = [jax.block_until_ready(r) for r in results]

    ref = _reference_loss(output, labels, images, reconstructions)
    assert np.allclose(float(results[0]), float(ref), rtol=1e-4, atol=1e-6), \
        (float(results[0]), float(ref))

    print("KERNEL_OK")
</pallas_src>

<mosaic_0001>
module attributes {stable_mosaic.version = 11 : i64} {
  func.func @_row_loss_kernel(%arg0: i32, %arg1: memref<5x3x128xf32, #tpu.memory_space<vmem>>, %arg2: memref<5x3x128xf32, #tpu.memory_space<vmem>>, %arg3: memref<10x128xf32, #tpu.memory_space<vmem>>) attributes {dimension_semantics = [#tpu.dimension_semantics<arbitrary>], iteration_bounds = array<i64: 1>, scalar_prefetch = 0 : i64, scratch_operands = 0 : i64, tpu.core_type = #tpu.core_type<tc>, window_params = [{transform_indices = @transform_0, window_bounds = array<i64: 5, 3, 128>}, {transform_indices = @transform_1, window_bounds = array<i64: 5, 3, 128>}, {pipeline_mode = #tpu.pipeline_mode<synchronous>, transform_indices = @transform_2, window_bounds = array<i64: 10, 128>}]} {
    %c0_i32 = arith.constant 0 : i32
    %0 = arith.cmpi eq, %arg0, %c0_i32 : i32
    %1 = arith.extui %0 : i1 to i32
    %c0_i32_0 = arith.constant 0 : i32
    %2 = arith.cmpi ne, %1, %c0_i32_0 : i32
    scf.if %2 {
      %cst_68 = arith.constant 0.000000e+00 : f32
      %128 = vector.broadcast %cst_68 : f32 to vector<10x128xf32>
      %c0_69 = arith.constant 0 : index
      %c0_70 = arith.constant 0 : index
      %129 = vector.load %arg3[%c0_69, %c0_70] : memref<10x128xf32, #tpu.memory_space<vmem>>, vector<10x128xf32>
      tpu.vector_store %arg3[%c0_69, %c0_70], %128 {strides = array<i32>} : memref<10x128xf32, #tpu.memory_space<vmem>>, vector<10x128xf32>,
    } else {
    }
    %c0 = arith.constant 0 : index
    %c0_1 = arith.constant 0 : index
    %c0_2 = arith.constant 0 : index
    %3 = vector.load %arg1[%c0, %c0_1, %c0_2] : memref<5x3x128xf32, #tpu.memory_space<vmem>>, vector<1x3x128xf32>
    %4 = vector.shape_cast %3 : vector<1x3x128xf32> to vector<3x128xf32>
    %c0_3 = arith.constant 0 : index
    %c0_4 = arith.constant 0 : index
    %c0_5 = arith.constant 0 : index
    %5 = vector.load %arg2[%c0_3, %c0_4, %c0_5] : memref<5x3x128xf32, #tpu.memory_space<vmem>>, vector<1x3x128xf32>
    %6 = vector.shape_cast %5 : vector<1x3x128xf32> to vector<3x128xf32>
    %cst = arith.constant 5.000000e-01 : f32
    %7 = vector.broadcast %cst : f32 to vector<3x128xf32>
    %8 = arith.cmpf ogt, %6, %7 : vector<3x128xf32>
    %cst_6 = arith.constant -5.000000e-01 : f32
    %9 = vector.broadcast %cst_6 : f32 to vector<3x128xf32>
    %10 = arith.cmpf olt, %6, %9 : vector<3x128xf32>
    %11 = arith.extui %8 : vector<3x128xi1> to vector<3x128xi32>
    %12 = arith.sitofp %11 : vector<3x128xi32> to vector<3x128xf32>
    %13 = arith.extui %10 : vector<3x128xi1> to vector<3x128xi32>
    %14 = arith.sitofp %13 : vector<3x128xi32> to vector<3x128xf32>
    %15 = arith.fptosi %6 : vector<3x128xf32> to vector<3x128xi32>
    %c1_i32 = arith.constant 1 : i32
    %16 = vector.broadcast %c1_i32 : i32 to vector<3x128xi32>
    %17 = arith.cmpi eq, %15, %16 : vector<3x128xi32>
    %18 = arith.extui %17 : vector<3x128xi1> to vector<3x128xi32>
    %19 = arith.sitofp %18 : vector<3x128xi32> to vector<3x128xf32>
    %cst_7 = arith.constant 0.899999976 : f32
    %20 = vector.broadcast %cst_7 : f32 to vector<3x128xf32>
    %21 = arith.subf %20, %4 : vector<3x128xf32>
    %cst_8 = arith.constant 0.000000e+00 : f32
    %22 = vector.broadcast %cst_8 : f32 to vector<3x128xf32>
    %23 = arith.maximumf %21, %22 : vector<3x128xf32>
    %24 = arith.mulf %23, %23 : vector<3x128xf32>
    %25 = arith.mulf %19, %24 : vector<3x128xf32>
    %cst_9 = arith.constant 1.000000e+00 : f32
    %26 = vector.broadcast %cst_9 : f32 to vector<3x128xf32>
    %27 = arith.subf %26, %19 : vector<3x128xf32>
    %cst_10 = arith.constant 5.000000e-01 : f32
    %28 = vector.broadcast %cst_10 : f32 to vector<3x128xf32>
    %29 = arith.mulf %28, %27 : vector<3x128xf32>
    %cst_11 = arith.constant 1.000000e-01 : f32
    %30 = vector.broadcast %cst_11 : f32 to vector<3x128xf32>
    %31 = arith.subf %4, %30 : vector<3x128xf32>
    %cst_12 = arith.constant 0.000000e+00 : f32
    %32 = vector.broadcast %cst_12 : f32 to vector<3x128xf32>
    %33 = arith.maximumf %31, %32 : vector<3x128xf32>
    %34 = arith.mulf %33, %33 : vector<3x128xf32>
    %35 = arith.mulf %29, %34 : vector<3x128xf32>
    %36 = arith.addf %25, %35 : vector<3x128xf32>
    %cst_13 = arith.constant 0.000000e+00 : f32
    %37 = vector.broadcast %cst_13 : f32 to vector<3x128xf32>
    %38 = arith.select %8, %36, %37 : vector<3x128xi1>, vector<3x128xf32>
    %cst_14 = arith.constant 1.000000e+00 : f32
    %39 = vector.broadcast %cst_14 : f32 to vector<3x128xf32>
    %40 = arith.addf %6, %39 : vector<3x128xf32>
    %41 = arith.fptosi %40 : vector<3x128xf32> to vector<3x128xi32>
    %c1_i32_15 = arith.constant 1 : i32
    %42 = vector.broadcast %c1_i32_15 : i32 to vector<3x128xi32>
    %43 = arith.cmpi eq, %41, %42 : vector<3x128xi32>
    %44 = arith.extui %43 : vector<3x128xi1> to vector<3x128xi32>
    %45 = arith.sitofp %44 : vector<3x128xi32> to vector<3x128xf32>
    %cst_16 = arith.constant 0.899999976 : f32
    %46 = vector.broadcast %cst_16 : f32 to vector<3x128xf32>
    %47 = arith.subf %46, %4 : vector<3x128xf32>
    %cst_17 = arith.constant 0.000000e+00 : f32
    %48 = vector.broadcast %cst_17 : f32 to vector<3x128xf32>
    %49 = arith.maximumf %47, %48 : vector<3x128xf32>
    %50 = arith.mulf %49, %49 : vector<3x128xf32>
    %51 = arith.mulf %45, %50 : vector<3x128xf32>
    %cst_18 = arith.constant 1.000000e+00 : f32
    %52 = vector.broadcast %cst_18 : f32 to vector<3x128xf32>
    %53 = arith.subf %52, %45 : vector<3x128xf32>
    %cst_19 = arith.constant 5.000000e-01 : f32
    %54 = vector.broadcast %cst_19 : f32 to vector<3x128xf32>
    %55 = arith.mulf %54, %53 : vector<3x128xf32>
    %cst_20 = arith.constant 1.000000e-01 : f32
    %56 = vector.broadcast %cst_20 : f32 to vector<3x128xf32>
    %57 = arith.subf %4, %56 : vector<3x128xf32>
    %cst_21 = arith.constant 0.000000e+00 : f32
    %58 = vector.broadcast %cst_21 : f32 to vector<3x128xf32>
    %59 = arith.maximumf %57, %58 : vector<3x128xf32>
    %60 = arith.mulf %59, %59 : vector<3x128xf32>
    %61 = arith.mulf %55, %60 : vector<3x128xf32>
    %62 = arith.addf %51, %61 : vector<3x128xf32>
    %cst_22 = arith.constant 0.000000e+00 : f32
    %63 = vector.broadcast %cst_22 : f32 to vector<3x128xf32>
    %64 = arith.select %10, %62, %63 : vector<3x128xi1>, vector<3x128xf32>
    %cst_23 = arith.constant 5.000000e-01 : f32
    %65 = vector.broadcast %cst_23 : f32 to vector<3x128xf32>
    %66 = arith.cmpf oge, %4, %65 : vector<3x128xf32>
    %67 = arith.andi %8, %66 : vector<3x128xi1>
    %cst_24 = arith.constant 1.000000e+00 : f32
    %cst_25 = arith.constant 0.000000e+00 : f32
    %68 = vector.broadcast %cst_24 : f32 to vector<3x128xf32>
    %69 = vector.broadcast %cst_25 : f32 to vector<3x128xf32>
    %70 = arith.select %67, %68, %69 : vector<3x128xi1>, vector<3x128xf32>
    %cst_26 = arith.constant 5.000000e-01 : f32
    %71 = vector.broadcast %cst_26 : f32 to vector<3x128xf32>
    %72 = arith.cmpf olt, %4, %71 : vector<3x128xf32>
    %73 = arith.andi %10, %72 : vector<3x128xi1>
    %cst_27 = arith.constant 1.000000e+00 : f32
    %cst_28 = arith.constant 0.000000e+00 : f32
    %74 = vector.broadcast %cst_27 : f32 to vector<3x128xf32>
    %75 = vector.broadcast %cst_28 : f32 to vector<3x128xf32>
    %76 = arith.select %73, %74, %75 : vector<3x128xi1>, vector<3x128xf32>
    %c0_29 = arith.constant 0 : index
    %c0_30 = arith.constant 0 : index
    %77 = vector.load %arg3[%c0_29, %c0_30] : memref<10x128xf32, #tpu.memory_space<vmem>>, vector<1x128xf32>
    %cst_31 = arith.constant dense<0.000000e+00> : vector<128xf32>
    %78 = vector.multi_reduction <add>, %12, %cst_31 [0] : vector<3x128xf32> to vector<128xf32>
    %79 = vector.shape_cast %78 : vector<128xf32> to vector<1x128xf32>
    %80 = arith.addf %77, %79 : vector<1x128xf32>
    %c0_32 = arith.constant 0 : index
    %c0_33 = arith.constant 0 : index
    %81 = vector.load %arg3[%c0_32, %c0_33] : memref<10x128xf32, #tpu.memory_space<vmem>>, vector<1x128xf32>
    tpu.vector_store %arg3[%c0_32, %c0_33], %80 {strides = array<i32>} : memref<10x128xf32, #tpu.memory_space<vmem>>, vector<1x128xf32>,
    %c1 = arith.constant 1 : index
    %c0_34 = arith.constant 0 : index
    %82 = vector.load %arg3[%c1, %c0_34] : memref<10x128xf32, #tpu.memory_space<vmem>>, vector<1x128xf32>
    %cst_35 = arith.constant dense<0.000000e+00> : vector<128xf32>
    %83 = vector.multi_reduction <add>, %14, %cst_35 [0] : vector<3x128xf32> to vector<128xf32>
    %84 = vector.shape_cast %83 : vector<128xf32> to vector<1x128xf32>
    %85 = arith.addf %82, %84 : vector<1x128xf32>
    %c1_36 = arith.constant 1 : index
    %c0_37 = arith.constant 0 : index
    %86 = vector.load %arg3[%c1_36, %c0_37] : memref<10x128xf32, #tpu.memory_space<vmem>>, vector<1x128xf32>
    tpu.vector_store %arg3[%c1_36, %c0_37], %85 {strides = array<i32>} : memref<10x128xf32, #tpu.memory_space<vmem>>, vector<1x128xf32>,
    %c2 = arith.constant 2 : index
    %c0_38 = arith.constant 0 : index
    %87 = vector.load %arg3[%c2, %c0_38] : memref<10x128xf32, #tpu.memory_space<vmem>>, vector<1x128xf32>
    %cst_39 = arith.constant dense<0.000000e+00> : vector<128xf32>
    %88 = vector.multi_reduction <add>, %38, %cst_39 [0] : vector<3x128xf32> to vector<128xf32>
    %89 = vector.shape_cast %88 : vector<128xf32> to vector<1x128xf32>
    %90 = arith.addf %87, %89 : vector<1x128xf32>
    %c2_40 = arith.constant 2 : index
    %c0_41 = arith.constant 0 : index
    %91 = vector.load %arg3[%c2_40, %c0_41] : memref<10x128xf32, #tpu.memory_space<vmem>>, vector<1x128xf32>
    tpu.vector_store %arg3[%c2_40, %c0_41], %90 {strides = array<i32>} : memref<10x128xf32, #tpu.memory_space<vmem>>, vector<1x128xf32>,
    %c3 = arith.constant 3 : index
    %c0_42 = arith.constant 0 : index
    %92 = vector.load %arg3[%c3, %c0_42] : memref<10x128xf32, #tpu.memory_space<vmem>>, vector<1x128xf32>
    %cst_43 = arith.constant dense<0.000000e+00> : vector<128xf32>
    %93 = vector.multi_reduction <add>, %64, %cst_43 [0] : vector<3x128xf32> to vector<128xf32>
    %94 = vector.shape_cast %93 : vector<128xf32> to vector<1x128xf32>
    %95 = arith.addf %92, %94 : vector<1x128xf32>
    %c3_44 = arith.constant 3 : index
    %c0_45 = arith.constant 0 : index
    %96 = vector.load %arg3[%c3_44, %c0_45] : memref<10x128xf32, #tpu.memory_space<vmem>>, vector<1x128xf32>
    tpu.vector_store %arg3[%c3_44, %c0_45], %95 {strides = array<i32>} : memref<10x128xf32, #tpu.memory_space<vmem>>, vector<1x128xf32>,
    %c8 = arith.constant 8 : index
    %c0_46 = arith.constant 0 : index
    %97 = vector.load %arg3[%c8, %c0_46] : memref<10x128xf32, #tpu.memory_space<vmem>>, vector<1x128xf32>
    %cst_47 = arith.constant dense<0.000000e+00> : vector<128xf32>
    %98 = vector.multi_reduction <add>, %70, %cst_47 [0] : vector<3x128xf32> to vector<128xf32>
    %99 = vector.shape_cast %98 : vector<128xf32> to vector<1x128xf32>
    %100 = arith.addf %97, %99 : vector<1x128xf32>
    %c8_48 = arith.constant 8 : index
    %c0_49 = arith.constant 0 : index
    %101 = vector.load %arg3[%c8_48, %c0_49] : memref<10x128xf32, #tpu.memory_space<vmem>>, vector<1x128xf32>
    tpu.vector_store %arg3[%c8_48, %c0_49], %100 {strides = array<i32>} : memref<10x128xf32, #tpu.memory_space<vmem>>, vector<1x128xf32>,
    %c9 = arith.constant 9 : index
    %c0_50 = arith.constant 0 : index
    %102 = vector.load %arg3[%c9, %c0_50] : memref<10x128xf32, #tpu.memory_space<vmem>>, vector<1x128xf32>
    %cst_51 = arith.constant dense<0.000000e+00> : vector<128xf32>
    %103 = vector.multi_reduction <add>, %76, %cst_51 [0] : vector<3x128xf32> to vector<128xf32>
    %104 = vector.shape_cast %103 : vector<128xf32> to vector<1x128xf32>
    %105 = arith.addf %102, %104 : vector<1x128xf32>
    %c9_52 = arith.constant 9 : index
    %c0_53 = arith.constant 0 : index
    %106 = vector.load %arg3[%c9_52, %c0_53] : memref<10x128xf32, #tpu.memory_space<vmem>>, vector<1x128xf32>
    tpu.vector_store %arg3[%c9_52, %c0_53], %105 {strides = array<i32>} : memref<10x128xf32, #tpu.memory_space<vmem>>, vector<1x128xf32>,
    %c1_54 = arith.constant 1 : index
    %c0_55 = arith.constant 0 : index
    %c0_56 = arith.constant 0 : index
    %107 = vector.load %arg1[%c1_54, %c0_55, %c0_56] : memref<5x3x128xf32, #tpu.memory_space<vmem>>, vector<4x3x128xf32>
    %c1_57 = arith.constant 1 : index
    %c0_58 = arith.constant 0 : index
    %c0_59 = arith.constant 0 : index
    %108 = vector.load %arg2[%c1_57, %c0_58, %c0_59] : memref<5x3x128xf32, #tpu.memory_space<vmem>>, vector<4x3x128xf32>
    %109 = arith.subf %107, %108 : vector<4x3x128xf32>
    %110 = math.absf %109 : vector<4x3x128xf32>
    %cst_60 = arith.constant 1.000000e+00 : f32
    %111 = vector.broadcast %cst_60 : f32 to vector<4x3x128xf32>
    %112 = arith.cmpf olt, %110, %111 : vector<4x3x128xf32>
    %cst_61 = arith.constant 5.000000e-01 : f32
    %113 = vector.broadcast %cst_61 : f32 to vector<4x3x128xf32>
    %114 = arith.mulf %113, %109 : vector<4x3x128xf32>
    %115 = arith.mulf %114, %109 : vector<4x3x128xf32>
    %cst_62 = arith.constant 5.000000e-01 : f32
    %116 = vector.broadcast %cst_62 : f32 to vector<4x3x128xf32>
    %117 = arith.subf %110, %116 : vector<4x3x128xf32>
    %118 = arith.select %112, %115, %117 : vector<4x3x128xi1>, vector<4x3x128xf32>
    %119 = vector.shape_cast %8 : vector<3x128xi1> to vector<1x3x128xi1>
    %cst_63 = arith.constant 0.000000e+00 : f32
    %120 = vector.shape_cast %119 : vector<1x3x128xi1> to vector<1x3x128xi1>
    %121 = vector.broadcast %120 : vector<1x3x128xi1> to vector<4x3x128xi1>
    %122 = vector.broadcast %cst_63 : f32 to vector<4x3x128xf32>
    %123 = arith.select %121, %118, %122 : vector<4x3x128xi1>, vector<4x3x128xf32>
    %c4 = arith.constant 4 : index
    %c0_64 = arith.constant 0 : index
    %124 = vector.load %arg3[%c4, %c0_64] : memref<10x128xf32, #tpu.memory_space<vmem>>, vector<4x128xf32>
    %cst_65 = arith.constant dense<0.000000e+00> : vector<4x128xf32>
    %125 = vector.multi_reduction <add>, %123, %cst_65 [1] : vector<4x3x128xf32> to vector<4x128xf32>
    %126 = arith.addf %124, %125 : vector<4x128xf32>
    %c4_66 = arith.constant 4 : index
    %c0_67 = arith.constant 0 : index
    %127 = vector.load %arg3[%c4_66, %c0_67] : memref<10x128xf32, #tpu.memory_space<vmem>>, vector<4x128xf32>
    tpu.vector_store %arg3[%c4_66, %c0_67], %126 {strides = array<i32>} : memref<10x128xf32, #tpu.memory_space<vmem>>, vector<4x128xf32>,
    return
  }
  func.func @transform_0(%arg0: i32) -> (i32, i32, i32) {
    %c0_i32 = arith.constant 0 : i32
    %c0_i32_0 = arith.constant 0 : i32
    %c0_i32_1 = arith.constant 0 : i32
    return %c0_i32, %arg0, %c0_i32_0 : i32, i32, i32
  }
  func.func @transform_1(%arg0: i32) -> (i32, i32, i32) {
    %c0_i32 = arith.constant 0 : i32
    %c0_i32_0 = arith.constant 0 : i32
    %c0_i32_1 = arith.constant 0 : i32
    return %c0_i32, %arg0, %c0_i32_0 : i32, i32, i32
  }
  func.func @transform_2(%arg0: i32) -> (i32, i32) {
    %c0_i32 = arith.constant 0 : i32
    %c0_i32_0 = arith.constant 0 : i32
    %c0_i32_1 = arith.constant 0 : i32
    return %c0_i32, %c0_i32_0 : i32, i32
  }
}

module attributes {stable_mosaic.version = 11 : i64} {
  func.func @_sse_kernel(%arg0: i32, %arg1: i32, %arg2: memref<32x128xf32, #tpu.memory_space<vmem>>, %arg3: memref<32x128xf32, #tpu.memory_space<vmem>>, %arg4: memref<1x128xf32, #tpu.memory_space<vmem>>) attributes {dimension_semantics = [#tpu.dimension_semantics<parallel>, #tpu.dimension_semantics<arbitrary>], iteration_bounds = array<i64: 2, 1>, scalar_prefetch = 0 : i64, scratch_operands = 0 : i64, tpu.core_type = #tpu.core_type<tc>, window_params = [{transform_indices = @transform_0, window_bounds = array<i64: 32, 128>}, {transform_indices = @transform_1, window_bounds = array<i64: 32, 128>}, {transform_indices = @transform_2, window_bounds = array<i64: 1, 128>}]} {
    %c0_i32 = arith.constant 0 : i32
    %0 = arith.cmpi eq, %arg1, %c0_i32 : i32
    %1 = arith.extui %0 : i1 to i32
    %c0_i32_0 = arith.constant 0 : i32
    %2 = arith.cmpi ne, %1, %c0_i32_0 : i32
    scf.if %2 {
      %cst_10 = arith.constant 0.000000e+00 : f32
      %22 = vector.broadcast %cst_10 : f32 to vector<1x128xf32>
      %c0_11 = arith.constant 0 : index
      %c0_12 = arith.constant 0 : index
      %23 = vector.load %arg4[%c0_11, %c0_12] : memref<1x128xf32, #tpu.memory_space<vmem>>, vector<1x128xf32>
      tpu.vector_store %arg4[%c0_11, %c0_12], %22 {strides = array<i32>} : memref<1x128xf32, #tpu.memory_space<vmem>>, vector<1x128xf32>,
    } else {
    }
    %c0 = arith.constant 0 : index
    %c0_1 = arith.constant 0 : index
    %3 = vector.load %arg2[%c0, %c0_1] : memref<32x128xf32, #tpu.memory_space<vmem>>, vector<32x128xf32>
    %c0_2 = arith.constant 0 : index
    %c0_3 = arith.constant 0 : index
    %4 = vector.load %arg3[%c0_2, %c0_3] : memref<32x128xf32, #tpu.memory_space<vmem>>, vector<32x128xf32>
    %5 = arith.subf %3, %4 : vector<32x128xf32>
    %6 = arith.mulf %5, %5 : vector<32x128xf32>
    %7 = tpu.iota {dimensions = array<i32: 0>} : vector<32x128xi32>
    %c1_i32 = arith.constant 1 : i32
    %8 = arith.muli %arg0, %c1_i32 : i32
    %9 = arith.addi %8, %arg1 : i32
    %c32_i32 = arith.constant 32 : i32
    %10 = arith.muli %9, %c32_i32 : i32
    %11 = vector.broadcast %10 : i32 to vector<32x128xi32>
    %12 = arith.addi %7, %11 : vector<32x128xi32>
    %c32_i32_4 = arith.constant 32 : i32
    %13 = vector.broadcast %c32_i32_4 : i32 to vector<32x128xi32>
    %14 = arith.cmpi slt, %12, %13 : vector<32x128xi32>
    %cst = arith.constant 0.000000e+00 : f32
    %15 = vector.broadcast %cst : f32 to vector<32x128xf32>
    %16 = arith.select %14, %6, %15 : vector<32x128xi1>, vector<32x128xf32>
    %c0_5 = arith.constant 0 : index
    %c0_6 = arith.constant 0 : index
    %17 = vector.load %arg4[%c0_5, %c0_6] : memref<1x128xf32, #tpu.memory_space<vmem>>, vector<1x128xf32>
    %cst_7 = arith.constant dense<0.000000e+00> : vector<128xf32>
    %18 = vector.multi_reduction <add>, %16, %cst_7 [0] : vector<32x128xf32> to vector<128xf32>
    %19 = vector.shape_cast %18 : vector<128xf32> to vector<1x128xf32>
    %20 = arith.addf %17, %19 : vector<1x128xf32>
    %c0_8 = arith.constant 0 : index
    %c0_9 = arith.constant 0 : index
    %21 = vector.load %arg4[%c0_8, %c0_9] : memref<1x128xf32, #tpu.memory_space<vmem>>, vector<1x128xf32>
    tpu.vector_store %arg4[%c0_8, %c0_9], %20 {strides = array<i32>} : memref<1x128xf32, #tpu.memory_space<vmem>>, vector<1x128xf32>,
    return
  }
  func.func @transform_0(%arg0: i32, %arg1: i32) -> (i32, i32) {
    %c1_i32 = arith.constant 1 : i32
    %0 = arith.muli %arg0, %c1_i32 : i32
    %1 = arith.addi %0, %arg1 : i32
    %c0_i32 = arith.constant 0 : i32
    %2 = arith.minsi %1, %c0_i32 : i32
    %c0_i32_0 = arith.constant 0 : i32
    %c0_i32_1 = arith.constant 0 : i32
    return %2, %c0_i32_0 : i32, i32
  }
  func.func @transform_1(%arg0: i32, %arg1: i32) -> (i32, i32) {
    %c1_i32 = arith.constant 1 : i32
    %0 = arith.muli %arg0, %c1_i32 : i32
    %1 = arith.addi %0, %arg1 : i32
    %c0_i32 = arith.constant 0 : i32
    %2 = arith.minsi %1, %c0_i32 : i32
    %c0_i32_0 = arith.constant 0 : i32
    %c0_i32_1 = arith.constant 0 : i32
    return %2, %c0_i32_0 : i32, i32
  }
  func.func @transform_2(%arg0: i32, %arg1: i32) -> (i32, i32) {
    %c0_i32 = arith.constant 0 : i32
    %c0_i32_0 = arith.constant 0 : i32
    return %c0_i32, %arg0 : i32, i32
  }
}

</mosaic_0001>

<bundles_post_ra>
// kernel: loss_recon_forward.2
= control target key start
LH: loop header
LB: loop body
LE: loop exit
PB: predicated region body
PF: predicated region fallthrough
CT: control target
= control target key end

     0   :  { %v236_v0 = vmov 0.0   ;;  %vm59_vm0 = vcmask 1042432   ;;  %vm195_vm15 = vcmask 1041409   ;;  %s402_s2 = inlined_call_operand.vmem [shape: f32[10,128], index: 2, kind: output, shape index: {}]   ;;  %s403_s1 = inlined_call_operand.vmem [shape: f32[5,3,128], index: 1, kind: input, shape index: {}]   ;;  %s404_s0 = inlined_call_operand.vmem [shape: f32[5,3,128], index: 0, kind: input, shape index: {}]  }
   0x1   :  { %15 = vst [vmem:[%s402_s2] sm:$0xff] %v236_v0  ;;  %v258_v1 = vld [vmem:[%s403_s1] sm:$0x7]  ;;  %v213_v16 = vld [vmem:[%s404_s0 + $0x4] sm:$0x7]  ;;  %v214_v26 = vld [vmem:[%s404_s0 + $0x8] sm:$0x7] }
   0x2   :  { %v17_v2 = vld [vmem:[%s404_s0] sm:$0x7]  ;;  %16 = vst [vmem:[%s402_s2 + $0x8] sm:$0x3] %v236_v0  ;;  %vm19_vm1 = vcmp.gt.f32.partialorder %v258_v1, 0.5  ;;  %vm20_vm2 = vcmp.lt.f32.partialorder %v258_v1, -0.5  ;;  %v226_v3 = vceil.f32 %v258_v1  ;;  %v227_v6 = vfloor.f32 %v258_v1 }
   0x3   :  { %vm225_vm3 = vcmp.lt.s32.totalorder %v258_v1, 0  ;;  %v208_v4 = vsel %vm19_vm1, 1.0, %v236_v0  ;;  %v209_v5 = vsel %vm20_vm2, 1.0, %v236_v0  ;;  %v29_v7 = vsub.f32 0.9, %v17_v2 }
   0x4   :  { %v60_v8 = vsel %vm59_vm0, %v208_v4, 0.0  ;;  %v70_v9 = vsel %vm59_vm0, %v209_v5, 0.0  ;;  %v211_v10 = vadd.f32 -0.1, %v17_v2  ;;  %v41_v11 = vadd.f32 1.0, %v258_v1 }
   0x5   :  { %v61_v12 = vrot.slane %v60_v8, 4  ;;  %v71_v13 = vrot.slane %v70_v9, 4  ;;  %v228_v14 = vsel %vm225_vm3, %v226_v3, %v227_v6  ;;  %v30_v15 = vmax.f32 %v29_v7, 0.0  ;;  %v217_v20 = vld [vmem:[%s403_s1 + $0x4] sm:$0x7] }
   0x6   :  { %v229_v17 = vcvt.f32.s32 %v228_v14  ;;  %v36_v18 = vmax.f32 %v211_v10, 0.0  ;;  %vm230_vm4 = vcmp.lt.s32.totalorder %v41_v11, 0  ;;  %v231_v19 = vceil.f32 %v41_v11  ;;  %v218_v32 = vld [vmem:[%s403_s1 + $0x8] sm:$0x7]  ;;  %v215_v40 = vld [vmem:[%s404_s0 + $0xc] sm:$0x7] }
   0x7   :  { %v62_v21 = vadd.f32 %v61_v12, %v60_v8  ;;  %v72_v22 = vadd.f32 %v71_v13, %v70_v9  ;;  %v31_v23 = vmul.f32 %v30_v15, %v30_v15  ;;  %v232_v24 = vfloor.f32 %v41_v11  ;;  %v216_v43 = vld [vmem:[%s404_s0 + $0x10] sm:$0x7]  ;;  %v219_v44 = vld [vmem:[%s403_s1 + $0xc] sm:$0x7] }
   0x8   :  { %vm26_vm5 = vcmp.eq.s32.totalorder %v229_v17, 1  ;;  %v37_v25 = vmul.f32 %v36_v18, %v36_v18  ;;  %vm52_vm6 = vcmp.ge.f32.partialorder %v17_v2, 0.5  ;;  %v287_v27 = vsub.f32 %v213_v16, %v217_v20  ;;  %v220_v50 = vld [vmem:[%s403_s1 + $0x10] sm:$0x7]  ;;  %v58_v51 = vld [vmem:[%s402_s2] sm:$0x1] }
   0x9   :  { %v63_v28 = vrot.slane %v62_v21, 2  ;;  %v73_v29 = vrot.slane %v72_v22, 2  ;;  %v210_v30 = vsel %vm26_vm5, 1.0, %v236_v0  ;;  %v233_v31 = vsel %vm230_vm4, %v231_v19, %v232_v24  ;;  %vm53_vm7 = vmand %vm19_vm1, %vm52_vm6  ;;  %v69_v52 = vld [vmem:[%s402_s2 + $0x1] sm:$0x1] }
   0xa   :  { %v32_v33 = vmul.f32 %v210_v30, %v31_v23  ;;  %v33_v34 = vsub.f32 1.0, %v210_v30  ;;  %v234_v35 = vcvt.f32.s32 %v233_v31  ;;  %v54_v36 = vsel %vm53_vm7, 1.0, %v236_v0  ;;  %v99_v11 = vld [vmem:[%s402_s2 + $0x8] sm:$0x1] }
   0xb   :  { %v64_v37 = vadd.f32 %v63_v28, %v62_v21  ;;  %v74_v38 = vadd.f32 %v73_v29, %v72_v22  ;;  %v100_v39 = vsel %vm59_vm0, %v54_v36, 0.0  ;;  %vm55_vm8 = vcmp.lt.f32.partialorder %v17_v2, 0.5 }
   0xc   :  { %v34_v41 = vmul.f32 0.5, %v33_v34  ;;  %vm43_vm9 = vcmp.eq.s32.totalorder %v234_v35, 1  ;;  %v101_v42 = vrot.slane %v100_v39, 4  ;;  %vm56_vm10 = vmand %vm20_vm2, %vm55_vm8  ;;  %v306_v45 = vsub.f32 %v214_v26, %v218_v32  ;;  %v109_v35 = vld [vmem:[%s402_s2 + $0x9] sm:$0x1] }
   0xd   :  { %v65_v46 = vrot.slane %v64_v37, 1  ;;  %v75_v47 = vrot.slane %v74_v38, 1  ;;  %v212_v48 = vsel %vm43_vm9, 1.0, %v236_v0  ;;  %v57_v49 = vsel %vm56_vm10, 1.0, %v236_v0 }
   0xe   :  { %v38_v53 = vmul.f32 %v37_v25, %v34_v41  ;;  %v46_v54 = vmul.f32 %v212_v48, %v31_v23  ;;  %v47_v55 = vsub.f32 1.0, %v212_v48  ;;  %v102_v56 = vadd.f32 %v101_v42, %v100_v39 }
   0xf   :  { %v66_v57 = vadd.f32 %v65_v46, %v64_v37  ;;  %v76_v58 = vadd.f32 %v75_v47, %v74_v38  ;;  %v110_v59 = vsel %vm59_vm0, %v57_v49, 0.0  ;;  %v131_v60 = vsub.f32 %v215_v40, %v219_v44 }
  0x10   :  { %v39_v61 = vadd.f32 %v38_v53, %v32_v33  ;;  %v48_v62 = vmul.f32 0.5, %v47_v55  ;;  %v103_v63 = vrot.slane %v102_v56, 2  ;;  %v111_v0 = vrot.slane %v110_v59, 4 }
  0x11   :  { %v67_v2 = vadd.f32 %v66_v57, %v58_v51  ;;  %v77_v3 = vadd.f32 %v76_v58, %v69_v52  ;;  %v132_v4 = vsub.f32 %v216_v43, %v220_v50  ;;  %v133_v5 = vand.u32 2147483647, %v287_v27 }
  0x12   :  { %v40_v6 = vsel %vm19_vm1, %v39_v61, 0.0  ;;  %v49_v7 = vmul.f32 %v48_v62, %v37_v25  ;;  %v104_v8 = vadd.f32 %v103_v63, %v102_v56  ;;  %v112_v9 = vadd.f32 %v111_v0, %v110_v59 }
  0x13   :  { %68 = vst [vmem:[%s402_s2] sm:$0x1] %v67_v2  ;;  %v80_v10 = vsel %vm59_vm0, %v40_v6, 0.0  ;;  %v134_v12 = vand.u32 2147483647, %v306_v45  ;;  %v135_v13 = vand.u32 2147483647, %v131_v60 }
  0x14   :  { %78 = vst [vmem:[%s402_s2 + $0x1] sm:$0x1] %v77_v3  ;;  %v81_v14 = vrot.slane %v80_v10, 4  ;;  %v50_v15 = vadd.f32 %v49_v7, %v46_v54  ;;  %v105_v16 = vrot.slane %v104_v8, 1  ;;  %v113_v17 = vrot.slane %v112_v9, 2 }
  0x15   :  { %v136_v18 = vand.u32 2147483647, %v132_v4  ;;  %vm332_vm11 = vcmp.lt.f32.partialorder %v133_v5, 1.0  ;;  %vm336_vm12 = vcmp.lt.f32.partialorder %v134_v12, 1.0  ;;  %vm340_vm13 = vcmp.lt.f32.partialorder %v135_v13, 1.0 }
  0x16   :  { %v82_v22 = vadd.f32 %v81_v14, %v80_v10  ;;  %v51_v23 = vsel %vm20_vm2, %v50_v15, 0.0  ;;  %v106_v24 = vadd.f32 %v105_v16, %v104_v8  ;;  %v114_v25 = vadd.f32 %v113_v17, %v112_v9 }
  0x17   :  { %v90_v26 = vsel %vm59_vm0, %v51_v23, 0.0  ;;  %vm347_vm14 = vcmp.lt.f32.partialorder %v136_v18, 1.0  ;;  %v141_v29 = vmul.f32 0.5, %v287_v27  ;;  %v142_v30 = vmul.f32 0.5, %v306_v45 }
  0x18   :  { %v83_v31 = vrot.slane %v82_v22, 2  ;;  %v91_v32 = vrot.slane %v90_v26, 4  ;;  %v107_v33 = vadd.f32 %v106_v24, %v99_v11  ;;  %v115_v34 = vrot.slane %v114_v25, 1 }
  0x19   :  { %v143_v36 = vmul.f32 0.5, %v131_v60  ;;  %v144_v37 = vmul.f32 0.5, %v132_v4  ;;  %v145_v38 = vmul.f32 %v141_v29, %v287_v27  ;;  %v146_v39 = vmul.f32 %v142_v30, %v306_v45  ;;  %v79_v27 = vld [vmem:[%s402_s2 + $0x2] sm:$0x1] }
  0x1a   :  { %v84_v40 = vadd.f32 %v83_v31, %v82_v22  ;;  %v92_v41 = vadd.f32 %v91_v32, %v90_v26  ;;  %108 = vst [vmem:[%s402_s2 + $0x8] sm:$0x1] %v107_v33  ;;  %v116_v42 = vadd.f32 %v115_v34, %v114_v25  ;;  %v221_v43 = vadd.f32 -0.5, %v133_v5  ;;  %v162_v32 = vld [vmem:[%s402_s2 + $0x4] sm:$0xf] }
  0x1b   :  { %v147_v44 = vmul.f32 %v143_v36, %v131_v60  ;;  %v148_v46 = vmul.f32 %v144_v37, %v132_v4  ;;  %v222_v47 = vadd.f32 -0.5, %v134_v12  ;;  %v223_v48 = vadd.f32 -0.5, %v135_v13  ;;  %v89_v4 = vld [vmem:[%s402_s2 + $0x3] sm:$0x1] }
  0x1c   :  { %v85_v49 = vrot.slane %v84_v40, 1  ;;  %v93_v50 = vrot.slane %v92_v41, 2  ;;  %v117_v51 = vadd.f32 %v116_v42, %v109_v35  ;;  %v224_v52 = vadd.f32 -0.5, %v136_v18 }
  0x1d   :  { %v153_v45 = vsel %vm332_vm11, %v145_v38, %v221_v43  ;;  %v154_v53 = vsel %vm336_vm12, %v146_v39, %v222_v47  ;;  %v155_v54 = vsel %vm340_vm13, %v147_v44, %v223_v48 }
  0x1e   :  { %v86_v55 = vadd.f32 %v85_v49, %v84_v40  ;;  %v94_v56 = vadd.f32 %v93_v50, %v92_v41  ;;  %118 = vst [vmem:[%s402_s2 + $0x9] sm:$0x1] %v117_v51  ;;  %v156_v57 = vsel %vm347_vm14, %v148_v46, %v224_v52  ;;  %v158_v58 = vsel %vm19_vm1, %v153_v45, 0.0 }
  0x1f   :  { %v159_v59 = vsel %vm19_vm1, %v154_v53, 0.0  ;;  %v160_v60 = vsel %vm19_vm1, %v155_v54, 0.0  ;;  %v161_v61 = vsel %vm19_vm1, %v156_v57, 0.0  ;;  %v163_v62 = vsel %vm59_vm0, %v158_v58, 0.0 }
  0x20   :  { %v87_v63 = vadd.f32 %v86_v55, %v79_v27  ;;  %v95_v0 = vrot.slane %v94_v56, 1  ;;  %v164_v2 = vrot.slane %v163_v62, 4  ;;  %v170_v3 = vsel %vm59_vm0, %v159_v59, 0.0 }
  0x21   :  { %v171_v5 = vrot.slane %v170_v3, 4  ;;  %v177_v6 = vsel %vm59_vm0, %v160_v60, 0.0  ;;  %v184_v7 = vsel %vm59_vm0, %v161_v61, 0.0  ;;  %vm197_vm0 = vcmask 1042434  }
  0x22   :  { %88 = vst [vmem:[%s402_s2 + $0x2] sm:$0x1] %v87_v63  ;;  %v96_v1 = vadd.f32 %v95_v0, %v94_v56  ;;  %v165_v8 = vadd.f32 %v164_v2, %v163_v62  ;;  %v178_v9 = vrot.slane %v177_v6, 4  ;;  %v185_v10 = vrot.slane %v184_v7, 4 }
  0x23   :  { %v172_v11 = vadd.f32 %v171_v5, %v170_v3  ;;  %vm199_vm1 = vcmask 1043459  }
  0x24   :  { %v97_v12 = vadd.f32 %v96_v1, %v89_v4  ;;  %v166_v13 = vrot.slane %v165_v8, 2  ;;  %v179_v14 = vadd.f32 %v178_v9, %v177_v6  ;;  %v186_v15 = vadd.f32 %v185_v10, %v184_v7 }
  0x25   :  { %v173_v16 = vrot.slane %v172_v11, 2 }
  0x26   :  { %98 = vst [vmem:[%s402_s2 + $0x3] sm:$0x1] %v97_v12  ;;  %v167_v17 = vadd.f32 %v166_v13, %v165_v8  ;;  %v180_v18 = vrot.slane %v179_v14, 2  ;;  %v187_v19 = vrot.slane %v186_v15, 2 }
  0x27   :  { %v174_v20 = vadd.f32 %v173_v16, %v172_v11 }
  0x28   :  { %v168_v21 = vrot.slane %v167_v17, 1  ;;  %v181_v22 = vadd.f32 %v180_v18, %v179_v14  ;;  %v188_v23 = vadd.f32 %v187_v19, %v186_v15 }
  0x29   :  { %v175_v24 = vrot.slane %v174_v20, 1 }
  0x2a   :  { %v169_v25 = vadd.f32 %v168_v21, %v167_v17  ;;  %v182_v26 = vrot.slane %v181_v22, 1  ;;  %v189_v28 = vrot.slane %v188_v23, 1 }
  0x2b   :  { %v176_v29 = vadd.f32 %v175_v24, %v174_v20 }
  0x2c   :  { %v183_v30 = vadd.f32 %v182_v26, %v181_v22  ;;  %v190_v31 = vadd.f32 %v189_v28, %v188_v23 }
  0x2d   :  { %v196_v33 = vsel %vm195_vm15, %v176_v29, %v169_v25 }
  0x2e   :  { %v198_v34 = vsel %vm197_vm0, %v183_v30, %v196_v33 }
  0x2f   :  { %v200_v35 = vsel %vm199_vm1, %v190_v31, %v198_v34 }
  0x30   :  { %v202_v36 = vadd.f32 %v200_v35, %v162_v32 }
  0x32   :  { %203 = vst [vmem:[%s402_s2 + $0x4] sm:$0xf] %v202_v36 }

// kernel: loss_recon_forward.3
= control target key start
LH: loop header
LB: loop body
LE: loop exit
PB: predicated region body
PF: predicated region fallthrough
CT: control target
= control target key end

     0   :  { %s415_s9 = smov 0   ;;  %s417_s10 = smov 0   ;;  %s456_s0 = inlined_call_operand.vmem [shape: f32[32,128], index: 0, kind: input, shape index: {}]   ;;  %s457_s1 = inlined_call_operand.vmem [shape: f32[32,128], index: 1, kind: input, shape index: {}]   ;;  %s458_s2 = inlined_call_operand.vmem [shape: f32[1,256], index: 2, kind: output, shape index: {}]  }
   0x1   :  { %s419_s11 = smov 0  }
   0x2 LB: > { %s24_s12 = sadd.s32 1, %s393_s10  ;;  %p342_p0 = scmp.ge.s32.totalorder %s397_s11, 1  ;;  %s397_s11 = sphi %s419_s11, %s12_s11   ;;  %s393_s10 = sphi %s417_s10, %s460_s10   ;;  %s389_s9 = sphi %s415_s9, %s459_s9  }
   0x3   : > { %p26_p1 = scmp.ge.s32.totalorder %s24_s12, 2  ;;  %p160_p2 = scmp.lt.s32.totalorder %s397_s11, 3 }
   0x5   : > { %s462_s12 = smov (%p26_p1, %s24_s12), 0  ;;  %p161_p3 = pnand %p342_p0, %p160_p2 }
   0x6   : > { %p215_p4 = scmp.lt.s32.totalorder (!%p161_p3), %s389_s9, 1  ;;  %p192_p5 = scmp.lt.s32.totalorder (!%p161_p3), %s389_s9, 0 }
   0x7   : > { %164 = sbr.rel (%p161_p3) target bundleno = 49 (0x31), region = 28  ;;  %s347_s19 = sshll.u32 (!%p161_p3), %s389_s9, 5 }
   0xc   : > { %v239_v0 = vlaneseq  ;;  %s216_s13 = scalar_select %p215_p4, %s389_s9, 1  ;;  %v399_v2 = vmov 0.0   ;;  %v246_v5 = vstv %s347_s19 }
   0xd   : > { %s193_s14 = scalar_select %p192_p5, %s389_s9, 0 }
   0xe   : > { %v240_v1 = vshrl.u32 %v239_v0, 7  ;;  %s436_s17 = scalar_lea.vmem %s458_s2, %s216_s13 }
   0xf   : > { %222 = vst [vmem:[%s436_s17] sm:$0x1] %v399_v2  ;;  %s343_s18 = sshll.u32 %s193_s14, 2 }
  0x10   : > { %p195_p6 = scmp.lt.s32.totalorder %s343_s18, 3  ;;  %v241_v3 = vadd.s32 8, %v240_v1  ;;  %v242_v4 = vadd.s32 16, %v240_v1  ;;  %v243_v6 = vadd.s32 24, %v240_v1  ;;  %v247_v7 = vadd.s32 %v246_v5, %v240_v1 }
  0x12   : > { %s464_s18 = smov (!%p195_p6, %s343_s18), 3  ;;  %v248_v8 = vadd.s32 %v246_v5, %v241_v3  ;;  %v249_v12 = vadd.s32 %v246_v5, %v242_v4  ;;  %v250_v16 = vadd.s32 %v246_v5, %v243_v6  ;;  %vm251_vm0 = vcmp.lt.s32.totalorder %v247_v7, 32 }
  0x13   : > { %s344_s20 = sshll.u32 %s464_s18, 3 }
  0x14   : > { %s198_s23 = scalar_lea.vmem %s456_s0, %s344_s20  ;;  %s210_s26 = scalar_lea.vmem %s457_s1, %s344_s20  ;;  %vm252_vm1 = vcmp.lt.s32.totalorder %v248_v8, 32  ;;  %vm253_vm2 = vcmp.lt.s32.totalorder %v249_v12, 32  ;;  %vm254_vm3 = vcmp.lt.s32.totalorder %v250_v16, 32 }
  0x15   : > { %v223_v9 = vld [vmem:[%s198_s23] sm:$0xff]  ;;  %v224_v10 = vld [vmem:[%s198_s23 + $0x8] sm:$0xff]  ;;  %v225_v11 = vld [vmem:[%s198_s23 + $0x10] sm:$0xff] }
  0x16   : > { %v226_v13 = vld [vmem:[%s198_s23 + $0x18] sm:$0xff]  ;;  %v227_v14 = vld [vmem:[%s210_s26] sm:$0xff]  ;;  %v228_v15 = vld [vmem:[%s210_s26 + $0x8] sm:$0xff] }
  0x17   : > { %v229_v17 = vld [vmem:[%s210_s26 + $0x10] sm:$0xff]  ;;  %v230_v18 = vld [vmem:[%s210_s26 + $0x18] sm:$0xff]  ;;  %v231_v19 = vsub.f32 %v223_v9, %v227_v14  ;;  %v232_v20 = vsub.f32 %v224_v10, %v228_v15  ;;  %v259_v39 = vld [vmem:[%s436_s17] sm:$0x1] }
  0x18   : > { %v233_v21 = vsub.f32 %v225_v11, %v229_v17  ;;  %v234_v22 = vsub.f32 %v226_v13, %v230_v18 }
  0x19   : > { %v235_v23 = vmul.f32 %v231_v19, %v231_v19  ;;  %v236_v24 = vmul.f32 %v232_v20, %v232_v20 }
  0x1a   : > { %v237_v25 = vmul.f32 %v233_v21, %v233_v21  ;;  %v238_v26 = vmul.f32 %v234_v22, %v234_v22 }
  0x1b   : > { %v255_v27 = vsel %vm251_vm0, %v235_v23, 0.0  ;;  %v256_v28 = vsel %vm252_vm1, %v236_v24, 0.0 }
  0x1c   : > { %v257_v29 = vsel %vm253_vm2, %v237_v25, 0.0  ;;  %v260_v30 = vadd.f32 %v256_v28, %v255_v27  ;;  %v258_v31 = vsel %vm254_vm3, %v238_v26, 0.0 }
  0x1e   : > { %v261_v32 = vadd.f32 %v260_v30, %v257_v29 }
  0x20   : > { %v262_v33 = vadd.f32 %v261_v32, %v258_v31 }
  0x22   : > { %v263_v34 = vrot.slane %v262_v33, 4 }
  0x24   : > { %v264_v35 = vadd.f32 %v263_v34, %v262_v33 }
  0x26   : > { %v265_v36 = vrot.slane %v264_v35, 2 }
  0x28   : > { %v266_v37 = vadd.f32 %v265_v36, %v264_v35 }
  0x2a   : > { %v267_v38 = vrot.slane %v266_v37, 1 }
  0x2c   : > { %v268_v40 = vadd.f32 %v267_v38, %v266_v37 }
  0x2e   : > { %v269_v41 = vadd.f32 %v268_v40, %v259_v39 }
  0x30   : > { %270 = vst [vmem:[%s436_s17] sm:$0x1] %v269_v41 }
  0x31 PF: > { %s12_s11 = sadd.s32 1, %s397_s11   ;;  %s459_s9 = smov %s393_s10 }
  0x32   : > { %p9_p7 = scmp.ge.s32.totalorder %s12_s11, 4   ;;  %s460_s10 = smov %s462_s12 }
  0x34   :  { %11 = sbr.rel (!%p9_p7) target bundleno = 2 (0x2), region = 65 }

</bundles_post_ra>
